<compile_context>
chip_gen: v6e
topology: v6e:2x2x1
jax: 0.10.0
libtpu: 0.0.40
codegen_flags: <defaults>
</compile_context>

<pallas_src>
import functools
import math

import numpy as np
import jax
import jax.numpy as jnp
from jax.experimental import pallas as pl
from jax.experimental.pallas import tpu as pltpu


def _pos_emb_kernel(x_ref, table_ref, out_ref):
    # x_ref: (tbr, 1) f32; table_ref: (2, dim) f32 [freqs ; phase offsets];
    # out_ref: (tbr, dim) f32.  One transcendental per output element.
    out_ref[...] = jnp.sin(x_ref[...] * table_ref[0:1, :] + table_ref[1:2, :])


def _pos_emb_folded_kernel(x_ref, table_ref, ones_ref, out_ref):
    # x_ref: (tbr, k) f32; ones_ref: (k, k*dim) block-diagonal ones;
    # table_ref: (2, k*dim) f32; out_ref: (tbr, k*dim) f32.
    # Broadcast each timestep across its dim-wide lane group via the idle MXU,
    # then a single sin over a full-width (lane-dense) tile.
    xb = jnp.dot(x_ref[...], ones_ref[...], preferred_element_type=jnp.float32)
    out_ref[...] = jnp.sin(xb * table_ref[0:1, :] + table_ref[1:2, :])


@functools.lru_cache(maxsize=None)
def _tables(dim, k):
    """Hoisted constants, cached per (dim, fold factor)."""
    half_dim = dim // 2
    scale = -math.log(10000.0) / (half_dim - 1)
    freqs_half = np.exp(np.arange(half_dim, dtype=np.float64) * scale)
    freqs = np.concatenate([freqs_half, freqs_half]).astype(np.float32)     # (dim,)
    offs = np.concatenate([np.zeros(half_dim), np.full(half_dim, np.pi / 2.0)]
                          ).astype(np.float32)                              # (dim,)
    table = np.stack([np.tile(freqs, k), np.tile(offs, k)])                 # (2, k*dim)
    ones = None
    if k > 1:
        ones = np.zeros((k, k * dim), np.float32)
        for g in range(k):
            ones[g, g * dim:(g + 1) * dim] = 1.0
    return jnp.asarray(table), (None if ones is None else jnp.asarray(ones))


def sinusoidal_pos_emb(x, dim, *, allow_jnp_fallback=False):
    """x: (B,) timesteps. Returns (B, dim) float32 embeddings [sin | cos]."""
    assert dim % 2 == 0 and dim >= 4, "dim must be even and >= 4"
    b = x.shape[0]
    x = x.astype(jnp.float32)

    if allow_jnp_fallback and b * dim <= 128 * 128:
        # TODO(synk): tiny-B production path -> fuse into consuming time-MLP
        # kernel (or let XLA fuse this jnp path); dispatch dominates here.
        table, _ = _tables(dim, 1)
        return jnp.sin(x[:, None] * table[0][None, :] + table[1][None, :])

    # Lane-fold narrow dims so stores are full 128-lane (unmasked).
    k = 128 // dim if (dim < 128 and 128 % dim == 0) else 1
    lane_w = k * dim
    table, ones = _tables(dim, k)

    # ---- tile selection over folded rows ----
    br = -(-b // k)                                    # folded row count
    bytes_per_row = (lane_w + 128) * 4 * 2             # out + lane-padded x, double-buffered
    vmem_budget = 8 * 1024 * 1024                      # safe under v5e/v6e/v7x scoped defaults
    tbr = min(1024, max(8, (vmem_budget // bytes_per_row) // 8 * 8))
    if br > 512:                                       # >=2 grid steps so both v7x TCs run
        tbr = min(tbr, max(8, ((-(-br // 2)) + 7) // 8 * 8))

    if br <= tbr:
        tbr = br                                       # single full block; no (8,128) constraint
        br_pad = br
    else:
        br_pad = -(-br // tbr) * tbr

    n_pad = br_pad * k
    if n_pad != b:
        x = jnp.pad(x, (0, n_pad - b))
    x2d = x.reshape(br_pad, k)

    grid = (br_pad // tbr,)
    params = pltpu.CompilerParams(dimension_semantics=("parallel",))

    if k > 1:
        out = pl.pallas_call(
            _pos_emb_folded_kernel,
            out_shape=jax.ShapeDtypeStruct((br_pad, lane_w), jnp.float32),
            grid=grid,
            in_specs=[
                pl.BlockSpec((tbr, k), lambda i: (i, 0)),
                pl.BlockSpec((2, lane_w), lambda i: (0, 0)),
                pl.BlockSpec((k, lane_w), lambda i: (0, 0)),
            ],
            out_specs=pl.BlockSpec((tbr, lane_w), lambda i: (i, 0)),
            compiler_params=params,
        )(x2d, table, ones)
        out = out.reshape(br_pad * k, dim)             # unfold rows back out of the lane axis
    else:
        out = pl.pallas_call(
            _pos_emb_kernel,
            out_shape=jax.ShapeDtypeStruct((br_pad, dim), jnp.float32),
            grid=grid,
            in_specs=[
                pl.BlockSpec((tbr, 1), lambda i: (i, 0)),
                pl.BlockSpec((2, dim), lambda i: (0, 0)),
            ],
            out_specs=pl.BlockSpec((tbr, dim), lambda i: (i, 0)),
            compiler_params=params,
        )(x2d, table)
    return out[:b]


def _reference(x, dim):
    half_dim = dim // 2
    emb = math.log(10000.0) / (half_dim - 1)
    emb = jnp.exp(jnp.arange(half_dim, dtype=jnp.float32) * -emb)
    emb = x.astype(jnp.float32)[:, None] * emb[None, :]
    return jnp.concatenate([jnp.sin(emb), jnp.cos(emb)], axis=-1)


if __name__ == "__main__":
    key = jax.random.PRNGKey(0)

    # Production-like tiny case: 8 diffusion timesteps, dim=32 (lane-folded path).
    B, DIM = 8, 32
    x = jax.random.uniform(key, (B,), dtype=jnp.float32, minval=0.0, maxval=1000.0)
    out = jax.block_until_ready(sinusoidal_pos_emb(x, DIM))
    ref = _reference(x, DIM)
    assert out.shape == (B, DIM)
    # sin(theta + pi/2) vs native cos differs by ~1 ulp of the phase (~1e-4 at
    # theta ~ 1e3); outputs are in [-1, 1] so compare with an absolute bound.
    assert jnp.max(jnp.abs(out - ref)) < 2e-4, "mismatch vs reference (folded path)"

    # Tiled lane-folded path: B > tile, not a multiple of the fold/tile.
    B2 = 3000
    x2 = jax.random.uniform(jax.random.PRNGKey(1), (B2,), dtype=jnp.float32,
                            minval=0.0, maxval=1000.0)
    out2 = jax.block_until_ready(sinusoidal_pos_emb(x2, DIM))
    ref2 = _reference(x2, DIM)
    assert out2.shape == (B2, DIM)
    assert jnp.max(jnp.abs(out2 - ref2)) < 2e-4, "tiled folded path mismatch"

    # Wide-dim path (no lane folding): dim >= 128.
    B3, DIM3 = 64, 256
    x3 = jax.random.uniform(jax.random.PRNGKey(2), (B3,), dtype=jnp.float32,
                            minval=0.0, maxval=1000.0)
    out3 = jax.block_until_ready(sinusoidal_pos_emb(x3, DIM3))
    ref3 = _reference(x3, DIM3)
    assert out3.shape == (B3, DIM3)
    assert jnp.max(jnp.abs(out3 - ref3)) < 2e-4, "wide-dim path mismatch"

    print("KERNEL_OK")
</pallas_src>

<mosaic_0001>
module attributes {stable_mosaic.version = 11 : i64} {
  func.func @_pos_emb_folded_kernel(%arg0: i32, %arg1: memref<2x4xf32, #tpu.memory_space<vmem>>, %arg2: memref<2x128xf32, #tpu.memory_space<vmem>>, %arg3: memref<4x128xf32, #tpu.memory_space<vmem>>, %arg4: memref<2x128xf32, #tpu.memory_space<vmem>>) attributes {dimension_semantics = [#tpu.dimension_semantics<parallel>], iteration_bounds = array<i64: 1>, scalar_prefetch = 0 : i64, scratch_operands = 0 : i64, tpu.core_type = #tpu.core_type<tc>, window_params = [{transform_indices = @transform_0, window_bounds = array<i64: 2, 4>}, {pipeline_mode = #tpu.pipeline_mode<synchronous>, transform_indices = @transform_1, window_bounds = array<i64: 2, 128>}, {pipeline_mode = #tpu.pipeline_mode<synchronous>, transform_indices = @transform_2, window_bounds = array<i64: 4, 128>}, {transform_indices = @transform_3, window_bounds = array<i64: 2, 128>}]} {
    %c0 = arith.constant 0 : index
    %c0_0 = arith.constant 0 : index
    %0 = vector.load %arg1[%c0, %c0_0] : memref<2x4xf32, #tpu.memory_space<vmem>>, vector<2x4xf32>
    %c0_1 = arith.constant 0 : index
    %c0_2 = arith.constant 0 : index
    %1 = vector.load %arg3[%c0_1, %c0_2] : memref<4x128xf32, #tpu.memory_space<vmem>>, vector<4x128xf32>
    %cst = arith.constant dense<0.000000e+00> : vector<2x128xf32>
    %2 = tpu.matmul %0, %1, %cst {dimension_numbers = #tpu.dot_dimension_numbers<[1], [0], [0], [1], [0, 0, 1, 1], [], []>} : vector<2x4xf32>, vector<4x128xf32>, vector<2x128xf32> -> vector<2x128xf32>
    %c0_3 = arith.constant 0 : index
    %c0_4 = arith.constant 0 : index
    %3 = vector.load %arg2[%c0_3, %c0_4] : memref<2x128xf32, #tpu.memory_space<vmem>>, vector<1x128xf32>
    %4 = vector.broadcast %3 : vector<1x128xf32> to vector<2x128xf32>
    %5 = arith.mulf %2, %4 : vector<2x128xf32>
    %c1 = arith.constant 1 : index
    %c0_5 = arith.constant 0 : index
    %6 = vector.load %arg2[%c1, %c0_5] : memref<2x128xf32, #tpu.memory_space<vmem>>, vector<1x128xf32>
    %7 = vector.broadcast %6 : vector<1x128xf32> to vector<2x128xf32>
    %8 = arith.addf %5, %7 : vector<2x128xf32>
    %9 = math.sin %8 : vector<2x128xf32>
    %c0_6 = arith.constant 0 : index
    %c0_7 = arith.constant 0 : index
    %10 = vector.load %arg4[%c0_6, %c0_7] : memref<2x128xf32, #tpu.memory_space<vmem>>, vector<2x128xf32>
    tpu.vector_store %arg4[%c0_6, %c0_7], %9 {strides = array<i32>} : memref<2x128xf32, #tpu.memory_space<vmem>>, vector<2x128xf32>,
    return
  }
  func.func @transform_0(%arg0: i32) -> (i32, i32) {
    %c0_i32 = arith.constant 0 : i32
    %c0_i32_0 = arith.constant 0 : i32
    return %arg0, %c0_i32 : i32, i32
  }
  func.func @transform_1(%arg0: i32) -> (i32, i32) {
    %c0_i32 = arith.constant 0 : i32
    %c0_i32_0 = arith.constant 0 : i32
    %c0_i32_1 = arith.constant 0 : i32
    return %c0_i32, %c0_i32_0 : i32, i32
  }
  func.func @transform_2(%arg0: i32) -> (i32, i32) {
    %c0_i32 = arith.constant 0 : i32
    %c0_i32_0 = arith.constant 0 : i32
    %c0_i32_1 = arith.constant 0 : i32
    return %c0_i32, %c0_i32_0 : i32, i32
  }
  func.func @transform_3(%arg0: i32) -> (i32, i32) {
    %c0_i32 = arith.constant 0 : i32
    %c0_i32_0 = arith.constant 0 : i32
    return %arg0, %c0_i32 : i32, i32
  }
}

</mosaic_0001>

<bundles_post_ra>
// kernel: tpu_custom_call.1
= control target key start
LH: loop header
LB: loop body
LE: loop exit
PB: predicated region body
PF: predicated region fallthrough
CT: control target
= control target key end

     0   :  { %8 = vsyncpa [#allocation3], 0  ;;  %s449_s0 = inlined_call_operand.hbm [shape: f32[2,4], index: 0, kind: input, shape index: {}]   ;;  %s450_s1 = inlined_call_operand.hbm [shape: f32[2,128], index: 1, kind: input, shape index: {}]   ;;  %s451_s2 = inlined_call_operand.hbm [shape: f32[4,128], index: 2, kind: input, shape index: {}]   ;;  %s452_s3 = inlined_call_operand.hbm [shape: f32[2,128], index: 3, kind: output, shape index: {}]  }
   0x1   :  { %9 = vsyncpa [#allocation6], 0 }
   0x2   :  { %10 = vsyncpa [#allocation4], 0  ;;  %s384_s12 = smov [#allocation5]   ;;  %s385_s14 = smov [#allocation2]  }
   0x3   :  { %s27_s13 = sshll.u32 %s384_s12, 4  ;;  %s17_s15 = sshll.u32 %s385_s14, 4  ;;  %s28_s13 = int_to_ptr.vmem [resolvable:$true] %s27_s13  ;;  %s18_s15 = int_to_ptr.vmem [resolvable:$true] %s17_s15 }
   0x4   :  { %s306_s16 = scalar_lea.vmem %s28_s13, 32  ;;  %p311_p1 = scmp.lt.s32.totalorder %s28_s13, %s28_s13 }
   0x5   :  { %p307_p0 = scmp.ne.s32.totalorder %s28_s13, %s306_s16  ;;  %p312_p2 = scmp.lt.s32.totalorder %s306_s16, %s306_s16 }
   0x7   :  { %p313_p3 = por %p312_p2, %p311_p1 }
   0x9   :  { %p314_p4 = pnand %p313_p3, %p307_p0 }
   0xb   :  { %317 = shalt.err (!%p314_p4)
}
   0xc   :  { %30 = dma.hbm_to_vmem [thread:$0]  %s450_s1, 32, %s28_s13, [#allocation6]  }
   0xd   :  { %s326_s19 = scalar_lea.vmem %s18_s15, 32  ;;  %p331_p6 = scmp.lt.s32.totalorder %s18_s15, %s18_s15 }
   0xe   :  { %p327_p5 = scmp.ne.s32.totalorder %s18_s15, %s326_s19  ;;  %p332_p7 = scmp.lt.s32.totalorder %s326_s19, %s326_s19 }
  0x10   :  { %p333_p8 = por %p332_p7, %p331_p6 }
  0x12   :  { %p334_p9 = pnand %p333_p8, %p327_p5 }
  0x14   :  { %337 = shalt.err (!%p334_p9)
}
  0x15   :  { %20 = dma.hbm_to_vmem [thread:$0]  %s449_s0, 32, %s18_s15, [#allocation3]  }
  0x16   :  { %s386_s22 = smov [#allocation7]  }
  0x17   :  { %s37_s23 = sshll.u32 %s386_s22, 4  ;;  %s38_s23 = int_to_ptr.vmem [resolvable:$true] %s37_s23 }
  0x18   :  { %s346_s24 = scalar_lea.vmem %s38_s23, 64  ;;  %p351_p11 = scmp.lt.s32.totalorder %s38_s23, %s38_s23 }
  0x19   :  { %p347_p10 = scmp.ne.s32.totalorder %s38_s23, %s346_s24  ;;  %p352_p12 = scmp.lt.s32.totalorder %s346_s24, %s346_s24 }
  0x1b   :  { %p353_p13 = por %p352_p12, %p351_p11 }
  0x1d   :  { %p354_p0 = pnand %p353_p13, %p347_p10 }
  0x1f   :  { %357 = shalt.err (!%p354_p0)
}
  0x20   :  { %40 = dma.hbm_to_vmem [thread:$0]  %s451_s2, 64, %s38_s23, [#allocation6]  }
  0x21   :  { %378 = dma.done.wait [#allocation3], 32  }
  0x22   :  { %379 = vsyncadd [#allocation3], 4294967264 }
  0x23   :  { %380 = dma.done.wait [#allocation6], 96  }
  0x24   :  { %381 = vsyncadd [#allocation6], 4294967200  ;;  %v387_v0 = vmov 0.0   ;;  %vm388_vm0 = vmmov 0   ;;  %vm56_vm1 = vcmask 1043456   ;;  %vm52_vm2 = vcmask 31744  }
  0x25   :  { %273 = vmatprep.subr.mxu0 %v387_v0  ;;  %275 = vmatprep.mubr.msk.f32.mxu0 %vm388_vm0, %v387_v0  ;;  %v51_v1 = vld [vmem:[#allocation7] sm:$0xf]  ;;  %v50_v2 = vld [vmem:[#allocation2] sm:$0x3]  ;;  %v265_v3 = vld [vmem:[#allocation5] ss:$0 sm:$0xff] }
  0x26   :  { %274 = vmatpush3.msk.msra.mxu0 %vm56_vm1, %v51_v1  ;;  %v266_v5 = vld [vmem:[#allocation5 + $0x1] ss:$0 sm:$0xff]  ;;  %v389_v20 = vmov 2102212464   ;;  %v390_v22 = vmov 920167782  }
  0x27   :  { %276 = vmatmul.mubr.msk.f32.vlgmr.msra.gmra.mxu0 %vm52_vm2, %v50_v2  ;;  %v391_v26 = vmov 1326507024   ;;  %v392_v28 = vmov 683565275   ;;  %v393_v30 = vmov 2475754826  }
  0x28   :  { %v394_v33 = vmov 2131351028   ;;  %s395_s0 = smov [#allocation8]  }
  0x29   :  { %s253_s2 = sshll.u32 %s395_s0, 4  ;;  %s254_s2 = int_to_ptr.vmem [resolvable:$true] %s253_s2 }
  0x2a   :  { %s358_s26 = scalar_lea.vmem %s254_s2, 32  ;;  %p363_p2 = scmp.lt.s32.totalorder %s254_s2, %s254_s2 }
  0x2b   :  { %p359_p1 = scmp.ne.s32.totalorder %s254_s2, %s358_s26  ;;  %p364_p3 = scmp.lt.s32.totalorder %s358_s26, %s358_s26 }
  0x2d   :  { %p365_p4 = por %p364_p3, %p363_p2 }
  0x2f   :  { %p366_p5 = pnand %p365_p4, %p359_p1 }
  0xe7   :  { %v126_v4 = vpop.f32.mrf.mxu0 }
  0xe8   :  { %v135_v6 = vmul.f32 %v265_v3, %v126_v4 }
  0xe9   :  { %v277_v7 = vpop.f32.mrf.mxu0 }
  0xea   :  { %v425_v8 = vadd.f32 %v266_v5, %v135_v6 }
  0xec   :  { %v145_v9 = vand.u32 2139095040, %v425_v8  ;;  %v142_v10 = vand.u32 2147483647, %v425_v8  ;;  %vm144_vm10 = vcmp.lt.s32.totalorder %v425_v8, 0  ;;  %vm234_vm15 = vweird.f32 %v425_v8 }
  0xee   :  { %v146_v11 = vshrl.u32 %v145_v9, 23  ;;  %v149_v13 = vand.u32 8388607, %v142_v10  ;;  %vm143_vm11 = vcmp.le.f32.partialorder %v142_v10, 0.7853982 }
  0xf0   :  { %v267_v12 = vadd.s32 4294967169, %v146_v11  ;;  %v150_v16 = vor.u32 8388608, %v149_v13 }
  0xf2   :  { %v152_v14 = vadd.s32 1, %v267_v12  ;;  %v190_v24 = vshll.u32 %v150_v16, 8 }
  0xf4   :  { %vm153_vm3 = vcmp.gt.s32.totalorder %v152_v14, 0 }
  0xf5   :  { %v154_v15 = vsel %vm153_vm3, %v152_v14, 0 }
  0xf6   :  { %v156_v17 = vand.u32 31, %v154_v15  ;;  %v155_v18 = vshrl.u32 %v154_v15, 5 }
  0xf8   :  { %v157_v19 = vsub.s32 32, %v156_v17  ;;  %v168_v21 = vshll.u32 %v389_v20, %v156_v17  ;;  %v171_v23 = vshll.u32 %v390_v22, %v156_v17  ;;  %v159_v29 = vshll.u32 %v392_v28, %v156_v17 }
  0xf9   :  { %v162_v32 = vshll.u32 %v393_v30, %v156_v17  ;;  %v165_v35 = vshll.u32 %v394_v33, %v156_v17  ;;  %vm177_vm4 = vcmp.lt.s32.totalorder %v155_v18, 4  ;;  %vm174_vm5 = vcmp.lt.s32.totalorder %v155_v18, 1 }
  0xfa   :  { %v169_v25 = vshrl.u32 %v390_v22, %v157_v19  ;;  %v172_v27 = vshrl.u32 %v391_v26, %v157_v19  ;;  %v160_v31 = vshrl.u32 %v393_v30, %v157_v19  ;;  %v163_v34 = vshrl.u32 %v394_v33, %v157_v19 }
  0xfb   :  { %v166_v36 = vshrl.u32 %v389_v20, %v157_v19  ;;  %v158_v40 = vshrl.u32 %v392_v28, %v157_v19  ;;  %vm175_vm6 = vcmp.lt.s32.totalorder %v155_v18, 2  ;;  %vm176_vm7 = vcmp.lt.s32.totalorder %v155_v18, 3 }
  0xfc   :  { %v170_v37 = vor.u32 %v169_v25, %v168_v21  ;;  %v173_v38 = vor.u32 %v172_v27, %v171_v23  ;;  %v161_v39 = vor.u32 %v160_v31, %v159_v29  ;;  %v164_v41 = vor.u32 %v163_v34, %v162_v32 }
  0xfd   :  { %v167_v42 = vor.u32 %v166_v36, %v165_v35 }
  0xfe   :  { %v183_v43 = vsel %vm177_vm4, %v170_v37, 920167782  ;;  %v187_v44 = vsel %vm177_vm4, %v173_v38, 1326507024  ;;  %v182_v46 = vsel %vm174_vm5, %v161_v39, %v164_v41  ;;  %v178_v49 = vsel %vm174_vm5, %v158_v40, %v161_v39 }
  0xff   :  { %v179_v45 = vsel %vm177_vm4, %v167_v42, 2102212464  ;;  %v184_v47 = vsel %vm176_vm7, %v167_v42, %v183_v43  ;;  %v186_v48 = vsel %vm174_vm5, %v164_v41, %v167_v42  ;;  %v188_v52 = vsel %vm176_vm7, %v170_v37, %v187_v44 }
 0x100   :  { %v180_v50 = vsel %vm176_vm7, %v164_v41, %v179_v45  ;;  %v185_v51 = vsel %vm175_vm6, %v182_v46, %v184_v47  ;;  %v189_v53 = vsel %vm175_vm6, %v186_v48, %v188_v52 }
 0x101   :  { %v431_v54 = vmul.u32.u64.low %v190_v24, %v185_v51  ;;  %v432_v55 = vmul.u32.u64.high %v190_v24, %v185_v51, %v431_v54  ;;  %v434_v56 = vmul.u32.u64.low %v190_v24, %v189_v53  ;;  %v435_v57 = vmul.u32.u64.high %v190_v24, %v189_v53, %v434_v56 }
 0x102   :  { %v181_v58 = vsel %vm175_vm6, %v178_v49, %v180_v50 }
 0x103   :  { %v200_v59 = vadd.s32 1, %v432_v55  ;;  %v197_v60 = vmul.u32 %v190_v24, %v181_v58  ;;  %vm199_vm8 = vc.u32 %v435_v57, %v431_v54  ;;  %v198_v9 = vadd.s32 %v431_v54, %v435_v57 }
 0x105   :  { %v201_v61 = vsel %vm199_vm8, %v200_v59, %v432_v55 }
 0x106   :  { %v202_v62 = vadd.s32 %v201_v61, %v197_v60 }
 0x108   :  { %v203_v63 = vadd.s32 536870912, %v202_v62 }
 0x10a   :  { %v204_v0 = vshrl.u32 %v203_v63, 30 }
 0x10c   :  { %v205_v1 = vshll.u32 %v204_v0, 30  ;;  %v228_v23 = vsub.s32 4, %v204_v0 }
 0x10e   :  { %v206_v2 = vsub.s32 %v202_v62, %v205_v1  ;;  %v229_v26 = vsel %vm144_vm10, %v228_v23, %v204_v0 }
 0x10f   :  { %v231_v27 = vsel %vm143_vm11, 0, %v229_v26 }
 0x110   :  { %v208_v3 = vsub.s32 0, %v206_v2  ;;  %v235_v28 = vadd.s32 3, %v231_v27 }
 0x112   :  { %v268_v4 = vmin.u32 %v208_v3, %v206_v2  ;;  %v236_v29 = vand.u32 3, %v235_v28 }
 0x114   :  { %v210_v5 = vclz %v268_v4  ;;  %vm241_vm12 = vcmp.eq.s32.totalorder %v236_v29, 2  ;;  %vm238_vm13 = vcmp.eq.s32.totalorder %v236_v29, 0  ;;  %vm237_vm14 = vcmp.lt.s32.totalorder %v236_v29, 2 }
 0x116   :  { %v269_v6 = vadd.s32 4294967294, %v210_v5 }
 0x118   :  { %vm270_vm9 = vcmp.lt.s32.totalorder %v269_v6, 0 }
 0x119   :  { %v213_v7 = vsel %vm270_vm9, 0, %v269_v6 }
 0x11a   :  { %v214_v11 = vsub.s32 32, %v213_v7  ;;  %v218_v12 = vsub.s32 4294967266, %v213_v7  ;;  %v215_v13 = vshll.u32 %v206_v2, %v213_v7 }
 0x11c   :  { %v216_v14 = vshrl.u32 %v198_v9, %v214_v11  ;;  %v219_v15 = vadd.s32 127, %v218_v12 }
 0x11e   :  { %v217_v16 = vor.u32 %v216_v14, %v215_v13  ;;  %v220_v17 = vshll.u32 %v219_v15, 23 }
 0x120   :  { %v221_v18 = vor.u32 4788187, %v220_v17  ;;  %v224_v20 = vcvt.s32.f32 %v217_v16 }
 0x122   :  { %v222_v19 = vand.u32 2147483647, %v221_v18 }
 0x124   :  { %v225_v21 = vmul.f32 %v224_v20, %v222_v19 }
 0x126   :  { %v226_v22 = vxor.u32 2147483648, %v225_v21 }
 0x128   :  { %v227_v24 = vsel %vm144_vm10, %v226_v22, %v225_v21 }
 0x129   :  { %v230_v25 = vsel %vm143_vm11, %v425_v8, %v227_v24 }
 0x12a   :  { %294 = vcosq.f32 %v230_v25 }
 0x12b   :  { %296 = vsinq.f32 %v230_v25 }
 0x137   :  { %v295_v30 = vpop.eup %294 }
 0x138   :  { %v297_v31 = vpop.eup %296  ;;  %v242_v32 = vxor.u32 2147483648, %v295_v30 }
 0x139   :  { %v239_v33 = vxor.u32 2147483648, %v297_v31 }
 0x13a   :  { %v243_v34 = vsel %vm241_vm12, %v242_v32, %v297_v31 }
 0x13b   :  { %v240_v10 = vsel %vm238_vm13, %v295_v30, %v239_v33 }
 0x13c   :  { %v244_v35 = vsel %vm237_vm14, %v240_v10, %v243_v34 }
 0x13d   :  { %v245_v36 = vsel %vm234_vm15, nan, %v244_v35 }
 0x13e   :  { %246 = vst [vmem:[#allocation8] sm:$0x3] %v245_v36 }
 0x13f   :  { %369 = shalt.err (!%p366_p5)
}
 0x140   :  { %256 = dma.vmem_to_hbm [thread:$0]  %s254_s2, 32, %s452_s3, [#allocation4]  }
 0x141   :  { %382 = dma.done.wait [#allocation4], 32  }
 0x142   :  { %383 = vsyncadd [#allocation4], 4294967264 }
 0x143   :  { %260 = vsyncpa [#allocation3], 1 }
 0x144   :  { %261 = vsyncpa [#allocation6], 1 }
 0x145   :  { %262 = vsyncpa [#allocation4], 1 }

</bundles_post_ra>
